<compile_context>
chip_gen: v5e
topology: v5e:2x2
jax: 0.10.0
libtpu: 0.0.40
codegen_flags: <defaults>
</compile_context>

<pallas_src>
import functools
import math

import jax
import jax.numpy as jnp
from jax.experimental import pallas as pl
from jax.experimental.pallas import tpu as pltpu

BN_EPS = 1e-5  # nn.BatchNorm2d default eps


def _round_up(x, m):
    return (x + m - 1) // m * m


def _col_masks(kw, pad, w_img, l_out_pad):
    """Width-padding lane masks, one per kw tap column (hoisted, reused kh x)."""
    col = jax.lax.broadcasted_iota(jnp.int32, (1, l_out_pad), 1) % w_img
    masks = []
    for j in range(kw):
        src_col = col + (j - pad)
        masks.append((src_col >= 0) & (src_col < w_img))
    return masks


def _stacked_taps(x, col_masks, *, kh, kw, w_img, l_out_pad, l_flat):
    """Build the (kh*kw*cin_pad, l_out_pad) stacked im2col operand for one image.

    x is the height-padded, width-flattened activation (cin_pad, l_flat).
    Window for tap (i, j) at output lane m is flat column (m + i*w_img + j);
    lanes whose source column fell in the width padding are masked to zero.
    Requires l_flat >= (kh-1)*w_img + (kw-1) + l_out_pad (no wrap into data).
    """
    parts = []
    for i in range(kh):
        for j in range(kw):
            start = i * w_img + j
            rolled = x if start == 0 else pltpu.roll(x, shift=l_flat - start, axis=1)
            window = rolled[:, :l_out_pad]
            parts.append(jnp.where(col_masks[j], window, 0))
    return jnp.concatenate(parts, axis=0)


def _conv_block(x_ref, w, col_masks, *, kh, kw, w_img, l_out_pad, l_flat):
    """One K=(kh*kw*cin_pad) MXU contraction for the whole B-image block.

    Returns the f32 conv output (cout, b_img * l_out_pad), image-major on lanes.
    """
    b_img = x_ref.shape[0]
    wins = [
        _stacked_taps(x_ref[b], col_masks, kh=kh, kw=kw, w_img=w_img,
                      l_out_pad=l_out_pad, l_flat=l_flat)
        for b in range(b_img)
    ]
    taps = wins[0] if b_img == 1 else jnp.concatenate(wins, axis=1)
    # Single matmul: (cout, K) x (K, B*l_out_pad), f32 accumulation on the MXU.
    # NOTE: no conv-bias add on purpose -- BatchNorm's per-channel mean
    # subtraction cancels it exactly.
    return jnp.dot(w, taps, preferred_element_type=jnp.float32)


def _conv_stats_kernel(x_ref, w_ref, psum_ref, psq_ref, *, kh, kw, pad, w_img,
                       l_out, l_out_pad, l_flat):
    """Pass 1 (stats only): per-block BN partial sum / sum-of-squares."""
    masks = _col_masks(kw, pad, w_img, l_out_pad)
    y = _conv_block(x_ref, w_ref[...], masks, kh=kh, kw=kw, w_img=w_img,
                    l_out_pad=l_out_pad, l_flat=l_flat)
    if l_out_pad != l_out:
        # Mask lane padding out of the statistics (only when H*W % 128 != 0).
        lane = jax.lax.broadcasted_iota(jnp.int32, (1, y.shape[1]), 1) % l_out_pad
        y = jnp.where(lane < l_out, y, 0.0)
    psum_ref[0] = jnp.sum(y, axis=1, keepdims=True)
    psq_ref[0] = jnp.sum(y * y, axis=1, keepdims=True)


def _conv_bn_relu_kernel(x_ref, w_ref, scale_ref, shift_ref, o_ref, *, kh, kw,
                         pad, w_img, l_out_pad, l_flat):
    """Pass 2: recompute implicit-GEMM conv, one per-channel FMA + ReLU."""
    masks = _col_masks(kw, pad, w_img, l_out_pad)
    y = _conv_block(x_ref, w_ref[...], masks, kh=kh, kw=kw, w_img=w_img,
                    l_out_pad=l_out_pad, l_flat=l_flat)
    # Lane-dense FMA + ReLU in f32 (scale/shift broadcast over lanes).
    z = jnp.maximum(y * scale_ref[...] + shift_ref[...], 0.0)
    for b in range(x_ref.shape[0]):
        o_ref[b] = z[:, b * l_out_pad:(b + 1) * l_out_pad]


def conv_bn_relu(x, weight, gamma, beta, *, padding=1, images_per_block=8,
                 mxu_dtype=jnp.float32):
    """Fused Conv2d(stride=1, 'same' width) + BatchNorm2d(batch stats) + ReLU.

    x: (N, Cin, H, W) NCHW.  weight: (Cout, Cin, KH, KW) PyTorch OIHW layout.
    The conv bias is intentionally not an argument: BatchNorm's per-channel
    mean subtraction cancels any per-channel bias exactly.
    """
    n, cin, h, w_img = x.shape
    cout, _, kh, kw = weight.shape
    ho = h + 2 * padding - kh + 1
    wo = w_img + 2 * padding - kw + 1
    if wo != w_img:
        raise ValueError("flattened-shift conv requires 'same' output width")
    l_out = ho * wo
    l_out_pad = _round_up(l_out, 128)         # full-lane stores for any H*W
    sublane = 16 if mxu_dtype == jnp.bfloat16 else 8
    cin_pad = _round_up(cin, sublane)         # tile-aligned tap stacking
    hp = h + 2 * padding

    # Images per grid step.  gcd keeps n % b_img == 0; for real workloads pick
    # images_per_block so double-buffered tiles are a few hundred KB - few MB,
    # and keep >= 2 grid steps so v7x's two TensorCores both get work.
    b_img = max(1, math.gcd(n, images_per_block))
    n_blocks = n // b_img

    # --- input prep: pads + reshape only (no transposes, no im2col in HBM) ---
    xp = jnp.pad(x.astype(jnp.float32),
                 ((0, 0), (0, cin_pad - cin), (padding, padding), (0, 0)))
    xflat = xp.reshape(n, cin_pad, hp * w_img)
    data_len = padding + hp * w_img
    need = max(data_len, (kh - 1) * w_img + (kw - 1) + l_out_pad)
    l_flat = _round_up(need, 128)             # roll-window no-wrap invariant
    xflat = jnp.pad(xflat, ((0, 0), (0, 0), (padding, l_flat - data_len)))
    xflat = xflat.astype(mxu_dtype)

    # --- stacked weights: (cout, kh*kw*cin_pad), matches the tap stacking ----
    wpad = jnp.pad(weight.astype(jnp.float32),
                   ((0, 0), (0, cin_pad - cin), (0, 0), (0, 0)))
    k_dim = kh * kw * cin_pad
    wstack = wpad.transpose(0, 2, 3, 1).reshape(cout, k_dim).astype(mxu_dtype)

    kparams = dict(kh=kh, kw=kw, pad=padding, w_img=w_img,
                   l_out_pad=l_out_pad, l_flat=l_flat)
    cparams = pltpu.CompilerParams(dimension_semantics=("parallel",),
                                   vmem_limit_bytes=32 * 1024 * 1024)

    # ---- pass 1 (stats only): per-block BN partial sums, no y round trip ----
    psum, psq = pl.pallas_call(
        functools.partial(_conv_stats_kernel, l_out=l_out, **kparams),
        grid=(n_blocks,),
        in_specs=[
            pl.BlockSpec((b_img, cin_pad, l_flat), lambda i: (i, 0, 0)),
            pl.BlockSpec((cout, k_dim), lambda i: (0, 0)),
        ],
        out_specs=(
            pl.BlockSpec((1, cout, 1), lambda i: (i, 0, 0)),
            pl.BlockSpec((1, cout, 1), lambda i: (i, 0, 0)),
        ),
        out_shape=(
            jax.ShapeDtypeStruct((n_blocks, cout, 1), jnp.float32),
            jax.ShapeDtypeStruct((n_blocks, cout, 1), jnp.float32),
        ),
        compiler_params=cparams,
    )(xflat, wstack)

    # ---- BN finalize on n_blocks*Cout scalars in the wrapper (hoisted) ------
    # One-pass variance kept in f32; see review note on cancellation if the
    # per-channel mean ever dominates the variance.
    count = float(n * l_out)
    mean = jnp.sum(psum, axis=0) / count                      # (cout, 1)
    var = jnp.sum(psq, axis=0) / count - mean * mean          # biased variance
    scale = gamma.reshape(cout, 1).astype(jnp.float32) * jax.lax.rsqrt(var + BN_EPS)
    shift = beta.reshape(cout, 1).astype(jnp.float32) - mean * scale

    # ---- pass 2: recompute conv (implicit GEMM) + FMA + ReLU, lane-dense ----
    out = pl.pallas_call(
        functools.partial(_conv_bn_relu_kernel, **kparams),
        grid=(n_blocks,),
        in_specs=[
            pl.BlockSpec((b_img, cin_pad, l_flat), lambda i: (i, 0, 0)),
            pl.BlockSpec((cout, k_dim), lambda i: (0, 0)),
            pl.BlockSpec((cout, 1), lambda i: (0, 0)),
            pl.BlockSpec((cout, 1), lambda i: (0, 0)),
        ],
        out_specs=pl.BlockSpec((b_img, cout, l_out_pad), lambda i: (i, 0, 0)),
        out_shape=jax.ShapeDtypeStruct((n, cout, l_out_pad), jnp.float32),
        compiler_params=cparams,
    )(xflat, wstack, scale, shift)

    # (N, Cout, Ho*Wo) -> NCHW is a free reshape (no transpose).
    return out[:, :, :l_out].reshape(n, cout, ho, wo)


def reference(x, weight, bias, gamma, beta, *, stride=1, padding=1):
    """Pure-JAX reference: conv (+bias) -> BN(batch stats) -> ReLU."""
    y = jax.lax.conv_general_dilated(
        x, weight, window_strides=(stride, stride),
        padding=[(padding, padding), (padding, padding)],
        dimension_numbers=("NCHW", "OIHW", "NCHW"),
        precision=jax.lax.Precision.HIGHEST,
    ) + bias.reshape(1, -1, 1, 1)
    mean = jnp.mean(y, axis=(0, 2, 3), keepdims=True)
    var = jnp.mean((y - mean) ** 2, axis=(0, 2, 3), keepdims=True)
    y_hat = (y - mean) * jax.lax.rsqrt(var + BN_EPS)
    out = gamma.reshape(1, -1, 1, 1) * y_hat + beta.reshape(1, -1, 1, 1)
    return jnp.maximum(out, 0.0)


if __name__ == "__main__":
    # N=4 so the demo exercises both B=2 image blocking and >= 2 grid steps.
    N, CIN, COUT, H, W, KH, KW = 4, 4, 8, 16, 16, 3, 3
    key = jax.random.PRNGKey(0)
    kx, kw_, kb = jax.random.split(key, 3)

    x = jax.random.normal(kx, (N, CIN, H, W), dtype=jnp.float32)

    # he_normal init: trunc_normal_(weight, std=sqrt(2/in_channels)), +-2 std.
    std = math.sqrt(2.0 / CIN)
    weight = jax.random.truncated_normal(
        kw_, -2.0, 2.0, (COUT, CIN, KH, KW), dtype=jnp.float32) * std
    # The module zero-inits the conv bias, but the *reference* gets a nonzero
    # bias to demonstrate that dropping it in the kernel is exact (BatchNorm's
    # mean subtraction cancels any per-channel bias).
    bias = 0.1 * jax.random.normal(kb, (COUT,), dtype=jnp.float32)
    gamma = jnp.ones((COUT,), jnp.float32)          # norm_init = 1.0
    beta = jnp.zeros((COUT,), jnp.float32)          # BN bias default zeros

    ref = jax.block_until_ready(reference(x, weight, bias, gamma, beta))

    # f32 MXU operands (strict-ish check; small slack for batch-stat summation
    # order / MXU f32 pass differences vs XLA).
    out = jax.block_until_ready(
        conv_bn_relu(x, weight, gamma, beta, padding=1, images_per_block=2))
    assert out.shape == (N, COUT, H, W)
    err = float(jnp.max(jnp.abs(out - ref)))
    assert jnp.allclose(out, ref, atol=5e-3, rtol=5e-3), f"f32 max err {err}"

    # bf16 MXU operands (v6e/v7x path), f32 accumulate + f32 BN/ReLU math.
    out_bf16 = jax.block_until_ready(
        conv_bn_relu(x, weight, gamma, beta, padding=1, images_per_block=2,
                     mxu_dtype=jnp.bfloat16))
    err_bf = float(jnp.max(jnp.abs(out_bf16 - ref)))
    assert jnp.allclose(out_bf16, ref, atol=5e-2, rtol=5e-2), \
        f"bf16 max err {err_bf}"

    print("KERNEL_OK")
</pallas_src>

<mosaic_0001>
module attributes {stable_mosaic.version = 11 : i64} {
  func.func @_conv_stats_kernel(%arg0: i32, %arg1: memref<2x8x384xf32, #tpu.memory_space<vmem>>, %arg2: memref<8x72xf32, #tpu.memory_space<vmem>>, %arg3: memref<1x8x1xf32, #tpu.memory_space<vmem>>, %arg4: memref<1x8x1xf32, #tpu.memory_space<vmem>>) attributes {dimension_semantics = [#tpu.dimension_semantics<parallel>], iteration_bounds = array<i64: 2>, scalar_prefetch = 0 : i64, scratch_operands = 0 : i64, tpu.core_type = #tpu.core_type<tc>, window_params = [{transform_indices = @transform_0, window_bounds = array<i64: 2, 8, 384>}, {pipeline_mode = #tpu.pipeline_mode<synchronous>, transform_indices = @transform_1, window_bounds = array<i64: 8, 72>}, {transform_indices = @transform_2, window_bounds = array<i64: 1, 8, 1>}, {transform_indices = @transform_3, window_bounds = array<i64: 1, 8, 1>}]} {
    %0 = tpu.iota {dimensions = array<i32: 1>} : vector<1x256xi32>
    %c16_i32 = arith.constant 16 : i32
    %c0_i32 = arith.constant 0 : i32
    %1 = arith.cmpi eq, %c16_i32, %c0_i32 : i32
    %c1_i32 = arith.constant 1 : i32
    %2 = arith.select %1, %c1_i32, %c16_i32 : i32
    %3 = vector.broadcast %2 : i32 to vector<1x256xi32>
    %4 = arith.remsi %0, %3 : vector<1x256xi32>
    %c0_i32_0 = arith.constant 0 : i32
    %5 = vector.broadcast %c0_i32_0 : i32 to vector<1x256xi32>
    %6 = arith.cmpi ne, %4, %5 : vector<1x256xi32>
    %c0_i32_1 = arith.constant 0 : i32
    %7 = vector.broadcast %c0_i32_1 : i32 to vector<1x256xi32>
    %8 = arith.cmpi slt, %4, %7 : vector<1x256xi32>
    %c0_i32_2 = arith.constant 0 : i32
    %9 = arith.cmpi slt, %2, %c0_i32_2 : i32
    %10 = vector.broadcast %9 : i1 to vector<1x256xi1>
    %11 = vector.broadcast %10 : vector<1x256xi1> to vector<1x256xi1>
    %12 = arith.xori %8, %11 : vector<1x256xi1>
    %13 = arith.andi %12, %6 : vector<1x256xi1>
    %14 = vector.broadcast %2 : i32 to vector<1x256xi32>
    %15 = arith.addi %4, %14 : vector<1x256xi32>
    %16 = arith.select %13, %15, %4 : vector<1x256xi1>, vector<1x256xi32>
    %c-1_i32 = arith.constant -1 : i32
    %17 = vector.broadcast %c-1_i32 : i32 to vector<1x256xi32>
    %18 = arith.addi %16, %17 : vector<1x256xi32>
    %c0_i32_3 = arith.constant 0 : i32
    %19 = vector.broadcast %c0_i32_3 : i32 to vector<1x256xi32>
    %20 = arith.cmpi sge, %18, %19 : vector<1x256xi32>
    %c16_i32_4 = arith.constant 16 : i32
    %21 = vector.broadcast %c16_i32_4 : i32 to vector<1x256xi32>
    %22 = arith.cmpi slt, %18, %21 : vector<1x256xi32>
    %23 = arith.andi %20, %22 : vector<1x256xi1>
    %c0_i32_5 = arith.constant 0 : i32
    %24 = vector.broadcast %c0_i32_5 : i32 to vector<1x256xi32>
    %25 = arith.addi %16, %24 : vector<1x256xi32>
    %c0_i32_6 = arith.constant 0 : i32
    %26 = vector.broadcast %c0_i32_6 : i32 to vector<1x256xi32>
    %27 = arith.cmpi sge, %25, %26 : vector<1x256xi32>
    %c16_i32_7 = arith.constant 16 : i32
    %28 = vector.broadcast %c16_i32_7 : i32 to vector<1x256xi32>
    %29 = arith.cmpi slt, %25, %28 : vector<1x256xi32>
    %30 = arith.andi %27, %29 : vector<1x256xi1>
    %c1_i32_8 = arith.constant 1 : i32
    %31 = vector.broadcast %c1_i32_8 : i32 to vector<1x256xi32>
    %32 = arith.addi %16, %31 : vector<1x256xi32>
    %c0_i32_9 = arith.constant 0 : i32
    %33 = vector.broadcast %c0_i32_9 : i32 to vector<1x256xi32>
    %34 = arith.cmpi sge, %32, %33 : vector<1x256xi32>
    %c16_i32_10 = arith.constant 16 : i32
    %35 = vector.broadcast %c16_i32_10 : i32 to vector<1x256xi32>
    %36 = arith.cmpi slt, %32, %35 : vector<1x256xi32>
    %37 = arith.andi %34, %36 : vector<1x256xi1>
    %c0 = arith.constant 0 : index
    %c0_11 = arith.constant 0 : index
    %38 = vector.load %arg2[%c0, %c0_11] : memref<8x72xf32, #tpu.memory_space<vmem>>, vector<8x72xf32>
    %c0_12 = arith.constant 0 : index
    %c0_13 = arith.constant 0 : index
    %c0_14 = arith.constant 0 : index
    %39 = vector.load %arg1[%c0_12, %c0_13, %c0_14] : memref<2x8x384xf32, #tpu.memory_space<vmem>>, vector<1x8x384xf32>
    %40 = vector.shape_cast %39 : vector<1x8x384xf32> to vector<8x384xf32>
    %41 = vector.extract_strided_slice %40 {offsets = [0, 0], sizes = [8, 256], strides = [1, 1]} : vector<8x384xf32> to vector<8x256xf32>
    %c0_i32_15 = arith.constant 0 : i32
    %42 = arith.sitofp %c0_i32_15 : i32 to f32
    %43 = vector.shape_cast %23 : vector<1x256xi1> to vector<1x256xi1>
    %44 = vector.broadcast %43 : vector<1x256xi1> to vector<8x256xi1>
    %45 = vector.broadcast %42 : f32 to vector<8x256xf32>
    %46 = arith.select %44, %41, %45 : vector<8x256xi1>, vector<8x256xf32>
    %c383_i32 = arith.constant 383 : i32
    %47 = tpu.dynamic_rotate %40 by %c383_i32 dim 1 : vector<8x384xf32>, i32 -> vector<8x384xf32>
    %48 = vector.extract_strided_slice %47 {offsets = [0, 0], sizes = [8, 256], strides = [1, 1]} : vector<8x384xf32> to vector<8x256xf32>
    %c0_i32_16 = arith.constant 0 : i32
    %49 = arith.sitofp %c0_i32_16 : i32 to f32
    %50 = vector.shape_cast %30 : vector<1x256xi1> to vector<1x256xi1>
    %51 = vector.broadcast %50 : vector<1x256xi1> to vector<8x256xi1>
    %52 = vector.broadcast %49 : f32 to vector<8x256xf32>
    %53 = arith.select %51, %48, %52 : vector<8x256xi1>, vector<8x256xf32>
    %c382_i32 = arith.constant 382 : i32
    %54 = tpu.dynamic_rotate %40 by %c382_i32 dim 1 : vector<8x384xf32>, i32 -> vector<8x384xf32>
    %55 = vector.extract_strided_slice %54 {offsets = [0, 0], sizes = [8, 256], strides = [1, 1]} : vector<8x384xf32> to vector<8x256xf32>
    %c0_i32_17 = arith.constant 0 : i32
    %56 = arith.sitofp %c0_i32_17 : i32 to f32
    %57 = vector.shape_cast %37 : vector<1x256xi1> to vector<1x256xi1>
    %58 = vector.broadcast %57 : vector<1x256xi1> to vector<8x256xi1>
    %59 = vector.broadcast %56 : f32 to vector<8x256xf32>
    %60 = arith.select %58, %55, %59 : vector<8x256xi1>, vector<8x256xf32>
    %c368_i32 = arith.constant 368 : i32
    %61 = tpu.dynamic_rotate %40 by %c368_i32 dim 1 : vector<8x384xf32>, i32 -> vector<8x384xf32>
    %62 = vector.extract_strided_slice %61 {offsets = [0, 0], sizes = [8, 256], strides = [1, 1]} : vector<8x384xf32> to vector<8x256xf32>
    %c0_i32_18 = arith.constant 0 : i32
    %63 = arith.sitofp %c0_i32_18 : i32 to f32
    %64 = vector.shape_cast %23 : vector<1x256xi1> to vector<1x256xi1>
    %65 = vector.broadcast %64 : vector<1x256xi1> to vector<8x256xi1>
    %66 = vector.broadcast %63 : f32 to vector<8x256xf32>
    %67 = arith.select %65, %62, %66 : vector<8x256xi1>, vector<8x256xf32>
    %c367_i32 = arith.constant 367 : i32
    %68 = tpu.dynamic_rotate %40 by %c367_i32 dim 1 : vector<8x384xf32>, i32 -> vector<8x384xf32>
    %69 = vector.extract_strided_slice %68 {offsets = [0, 0], sizes = [8, 256], strides = [1, 1]} : vector<8x384xf32> to vector<8x256xf32>
    %c0_i32_19 = arith.constant 0 : i32
    %70 = arith.sitofp %c0_i32_19 : i32 to f32
    %71 = vector.shape_cast %30 : vector<1x256xi1> to vector<1x256xi1>
    %72 = vector.broadcast %71 : vector<1x256xi1> to vector<8x256xi1>
    %73 = vector.broadcast %70 : f32 to vector<8x256xf32>
    %74 = arith.select %72, %69, %73 : vector<8x256xi1>, vector<8x256xf32>
    %c366_i32 = arith.constant 366 : i32
    %75 = tpu.dynamic_rotate %40 by %c366_i32 dim 1 : vector<8x384xf32>, i32 -> vector<8x384xf32>
    %76 = vector.extract_strided_slice %75 {offsets = [0, 0], sizes = [8, 256], strides = [1, 1]} : vector<8x384xf32> to vector<8x256xf32>
    %c0_i32_20 = arith.constant 0 : i32
    %77 = arith.sitofp %c0_i32_20 : i32 to f32
    %78 = vector.shape_cast %37 : vector<1x256xi1> to vector<1x256xi1>
    %79 = vector.broadcast %78 : vector<1x256xi1> to vector<8x256xi1>
    %80 = vector.broadcast %77 : f32 to vector<8x256xf32>
    %81 = arith.select %79, %76, %80 : vector<8x256xi1>, vector<8x256xf32>
    %c352_i32 = arith.constant 352 : i32
    %82 = tpu.dynamic_rotate %40 by %c352_i32 dim 1 : vector<8x384xf32>, i32 -> vector<8x384xf32>
    %83 = vector.extract_strided_slice %82 {offsets = [0, 0], sizes = [8, 256], strides = [1, 1]} : vector<8x384xf32> to vector<8x256xf32>
    %c0_i32_21 = arith.constant 0 : i32
    %84 = arith.sitofp %c0_i32_21 : i32 to f32
    %85 = vector.shape_cast %23 : vector<1x256xi1> to vector<1x256xi1>
    %86 = vector.broadcast %85 : vector<1x256xi1> to vector<8x256xi1>
    %87 = vector.broadcast %84 : f32 to vector<8x256xf32>
    %88 = arith.select %86, %83, %87 : vector<8x256xi1>, vector<8x256xf32>
    %c351_i32 = arith.constant 351 : i32
    %89 = tpu.dynamic_rotate %40 by %c351_i32 dim 1 : vector<8x384xf32>, i32 -> vector<8x384xf32>
    %90 = vector.extract_strided_slice %89 {offsets = [0, 0], sizes = [8, 256], strides = [1, 1]} : vector<8x384xf32> to vector<8x256xf32>
    %c0_i32_22 = arith.constant 0 : i32
    %91 = arith.sitofp %c0_i32_22 : i32 to f32
    %92 = vector.shape_cast %30 : vector<1x256xi1> to vector<1x256xi1>
    %93 = vector.broadcast %92 : vector<1x256xi1> to vector<8x256xi1>
    %94 = vector.broadcast %91 : f32 to vector<8x256xf32>
    %95 = arith.select %93, %90, %94 : vector<8x256xi1>, vector<8x256xf32>
    %c350_i32 = arith.constant 350 : i32
    %96 = tpu.dynamic_rotate %40 by %c350_i32 dim 1 : vector<8x384xf32>, i32 -> vector<8x384xf32>
    %97 = vector.extract_strided_slice %96 {offsets = [0, 0], sizes = [8, 256], strides = [1, 1]} : vector<8x384xf32> to vector<8x256xf32>
    %c0_i32_23 = arith.constant 0 : i32
    %98 = arith.sitofp %c0_i32_23 : i32 to f32
    %99 = vector.shape_cast %37 : vector<1x256xi1> to vector<1x256xi1>
    %100 = vector.broadcast %99 : vector<1x256xi1> to vector<8x256xi1>
    %101 = vector.broadcast %98 : f32 to vector<8x256xf32>
    %102 = arith.select %100, %97, %101 : vector<8x256xi1>, vector<8x256xf32>
    %103 = tpu.concatenate %46, %53, %60, %67, %74, %81, %88, %95, %102 in 0 : vector<8x256xf32>, vector<8x256xf32>, vector<8x256xf32>, vector<8x256xf32>, vector<8x256xf32>, vector<8x256xf32>, vector<8x256xf32>, vector<8x256xf32>, vector<8x256xf32> -> vector<72x256xf32>
    %c1 = arith.constant 1 : index
    %c0_24 = arith.constant 0 : index
    %c0_25 = arith.constant 0 : index
    %104 = vector.load %arg1[%c1, %c0_24, %c0_25] : memref<2x8x384xf32, #tpu.memory_space<vmem>>, vector<1x8x384xf32>
    %105 = vector.shape_cast %104 : vector<1x8x384xf32> to vector<8x384xf32>
    %106 = vector.extract_strided_slice %105 {offsets = [0, 0], sizes = [8, 256], strides = [1, 1]} : vector<8x384xf32> to vector<8x256xf32>
    %c0_i32_26 = arith.constant 0 : i32
    %107 = arith.sitofp %c0_i32_26 : i32 to f32
    %108 = vector.shape_cast %23 : vector<1x256xi1> to vector<1x256xi1>
    %109 = vector.broadcast %108 : vector<1x256xi1> to vector<8x256xi1>
    %110 = vector.broadcast %107 : f32 to vector<8x256xf32>
    %111 = arith.select %109, %106, %110 : vector<8x256xi1>, vector<8x256xf32>
    %c383_i32_27 = arith.constant 383 : i32
    %112 = tpu.dynamic_rotate %105 by %c383_i32_27 dim 1 : vector<8x384xf32>, i32 -> vector<8x384xf32>
    %113 = vector.extract_strided_slice %112 {offsets = [0, 0], sizes = [8, 256], strides = [1, 1]} : vector<8x384xf32> to vector<8x256xf32>
    %c0_i32_28 = arith.constant 0 : i32
    %114 = arith.sitofp %c0_i32_28 : i32 to f32
    %115 = vector.shape_cast %30 : vector<1x256xi1> to vector<1x256xi1>
    %116 = vector.broadcast %115 : vector<1x256xi1> to vector<8x256xi1>
    %117 = vector.broadcast %114 : f32 to vector<8x256xf32>
    %118 = arith.select %116, %113, %117 : vector<8x256xi1>, vector<8x256xf32>
    %c382_i32_29 = arith.constant 382 : i32
    %119 = tpu.dynamic_rotate %105 by %c382_i32_29 dim 1 : vector<8x384xf32>, i32 -> vector<8x384xf32>
    %120 = vector.extract_strided_slice %119 {offsets = [0, 0], sizes = [8, 256], strides = [1, 1]} : vector<8x384xf32> to vector<8x256xf32>
    %c0_i32_30 = arith.constant 0 : i32
    %121 = arith.sitofp %c0_i32_30 : i32 to f32
    %122 = vector.shape_cast %37 : vector<1x256xi1> to vector<1x256xi1>
    %123 = vector.broadcast %122 : vector<1x256xi1> to vector<8x256xi1>
    %124 = vector.broadcast %121 : f32 to vector<8x256xf32>
    %125 = arith.select %123, %120, %124 : vector<8x256xi1>, vector<8x256xf32>
    %c368_i32_31 = arith.constant 368 : i32
    %126 = tpu.dynamic_rotate %105 by %c368_i32_31 dim 1 : vector<8x384xf32>, i32 -> vector<8x384xf32>
    %127 = vector.extract_strided_slice %126 {offsets = [0, 0], sizes = [8, 256], strides = [1, 1]} : vector<8x384xf32> to vector<8x256xf32>
    %c0_i32_32 = arith.constant 0 : i32
    %128 = arith.sitofp %c0_i32_32 : i32 to f32
    %129 = vector.shape_cast %23 : vector<1x256xi1> to vector<1x256xi1>
    %130 = vector.broadcast %129 : vector<1x256xi1> to vector<8x256xi1>
    %131 = vector.broadcast %128 : f32 to vector<8x256xf32>
    %132 = arith.select %130, %127, %131 : vector<8x256xi1>, vector<8x256xf32>
    %c367_i32_33 = arith.constant 367 : i32
    %133 = tpu.dynamic_rotate %105 by %c367_i32_33 dim 1 : vector<8x384xf32>, i32 -> vector<8x384xf32>
    %134 = vector.extract_strided_slice %133 {offsets = [0, 0], sizes = [8, 256], strides = [1, 1]} : vector<8x384xf32> to vector<8x256xf32>
    %c0_i32_34 = arith.constant 0 : i32
    %135 = arith.sitofp %c0_i32_34 : i32 to f32
    %136 = vector.shape_cast %30 : vector<1x256xi1> to vector<1x256xi1>
    %137 = vector.broadcast %136 : vector<1x256xi1> to vector<8x256xi1>
    %138 = vector.broadcast %135 : f32 to vector<8x256xf32>
    %139 = arith.select %137, %134, %138 : vector<8x256xi1>, vector<8x256xf32>
    %c366_i32_35 = arith.constant 366 : i32
    %140 = tpu.dynamic_rotate %105 by %c366_i32_35 dim 1 : vector<8x384xf32>, i32 -> vector<8x384xf32>
    %141 = vector.extract_strided_slice %140 {offsets = [0, 0], sizes = [8, 256], strides = [1, 1]} : vector<8x384xf32> to vector<8x256xf32>
    %c0_i32_36 = arith.constant 0 : i32
    %142 = arith.sitofp %c0_i32_36 : i32 to f32
    %143 = vector.shape_cast %37 : vector<1x256xi1> to vector<1x256xi1>
    %144 = vector.broadcast %143 : vector<1x256xi1> to vector<8x256xi1>
    %145 = vector.broadcast %142 : f32 to vector<8x256xf32>
    %146 = arith.select %144, %141, %145 : vector<8x256xi1>, vector<8x256xf32>
    %c352_i32_37 = arith.constant 352 : i32
    %147 = tpu.dynamic_rotate %105 by %c352_i32_37 dim 1 : vector<8x384xf32>, i32 -> vector<8x384xf32>
    %148 = vector.extract_strided_slice %147 {offsets = [0, 0], sizes = [8, 256], strides = [1, 1]} : vector<8x384xf32> to vector<8x256xf32>
    %c0_i32_38 = arith.constant 0 : i32
    %149 = arith.sitofp %c0_i32_38 : i32 to f32
    %150 = vector.shape_cast %23 : vector<1x256xi1> to vector<1x256xi1>
    %151 = vector.broadcast %150 : vector<1x256xi1> to vector<8x256xi1>
    %152 = vector.broadcast %149 : f32 to vector<8x256xf32>
    %153 = arith.select %151, %148, %152 : vector<8x256xi1>, vector<8x256xf32>
    %c351_i32_39 = arith.constant 351 : i32
    %154 = tpu.dynamic_rotate %105 by %c351_i32_39 dim 1 : vector<8x384xf32>, i32 -> vector<8x384xf32>
    %155 = vector.extract_strided_slice %154 {offsets = [0, 0], sizes = [8, 256], strides = [1, 1]} : vector<8x384xf32> to vector<8x256xf32>
    %c0_i32_40 = arith.constant 0 : i32
    %156 = arith.sitofp %c0_i32_40 : i32 to f32
    %157 = vector.shape_cast %30 : vector<1x256xi1> to vector<1x256xi1>
    %158 = vector.broadcast %157 : vector<1x256xi1> to vector<8x256xi1>
    %159 = vector.broadcast %156 : f32 to vector<8x256xf32>
    %160 = arith.select %158, %155, %159 : vector<8x256xi1>, vector<8x256xf32>
    %c350_i32_41 = arith.constant 350 : i32
    %161 = tpu.dynamic_rotate %105 by %c350_i32_41 dim 1 : vector<8x384xf32>, i32 -> vector<8x384xf32>
    %162 = vector.extract_strided_slice %161 {offsets = [0, 0], sizes = [8, 256], strides = [1, 1]} : vector<8x384xf32> to vector<8x256xf32>
    %c0_i32_42 = arith.constant 0 : i32
    %163 = arith.sitofp %c0_i32_42 : i32 to f32
    %164 = vector.shape_cast %37 : vector<1x256xi1> to vector<1x256xi1>
    %165 = vector.broadcast %164 : vector<1x256xi1> to vector<8x256xi1>
    %166 = vector.broadcast %163 : f32 to vector<8x256xf32>
    %167 = arith.select %165, %162, %166 : vector<8x256xi1>, vector<8x256xf32>
    %168 = tpu.concatenate %111, %118, %125, %132, %139, %146, %153, %160, %167 in 0 : vector<8x256xf32>, vector<8x256xf32>, vector<8x256xf32>, vector<8x256xf32>, vector<8x256xf32>, vector<8x256xf32>, vector<8x256xf32>, vector<8x256xf32>, vector<8x256xf32> -> vector<72x256xf32>
    %169 = tpu.concatenate %103, %168 in 1 : vector<72x256xf32>, vector<72x256xf32> -> vector<72x512xf32>
    %cst = arith.constant dense<0.000000e+00> : vector<8x512xf32>
    %170 = tpu.matmul %38, %169, %cst {dimension_numbers = #tpu.dot_dimension_numbers<[1], [0], [0], [1], [0, 0, 1, 1], [], []>} : vector<8x72xf32>, vector<72x512xf32>, vector<8x512xf32> -> vector<8x512xf32>
    %cst_43 = arith.constant dense<0.000000e+00> : vector<8xf32>
    %171 = vector.multi_reduction <add>, %170, %cst_43 [1] : vector<8x512xf32> to vector<8xf32>
    %172 = vector.shape_cast %171 : vector<8xf32> to vector<8x1xf32>
    %c0_44 = arith.constant 0 : index
    %c0_45 = arith.constant 0 : index
    %c0_46 = arith.constant 0 : index
    %173 = vector.load %arg3[%c0_44, %c0_45, %c0_46] : memref<1x8x1xf32, #tpu.memory_space<vmem>>, vector<1x8x1xf32>
    %174 = vector.shape_cast %173 : vector<1x8x1xf32> to vector<8x1xf32>
    %175 = vector.shape_cast %172 : vector<8x1xf32> to vector<1x8x1xf32>
    tpu.vector_store %arg3[%c0_44, %c0_45, %c0_46], %175 {strides = array<i32>} : memref<1x8x1xf32, #tpu.memory_space<vmem>>, vector<1x8x1xf32>,
    %176 = arith.mulf %170, %170 : vector<8x512xf32>
    %cst_47 = arith.constant dense<0.000000e+00> : vector<8xf32>
    %177 = vector.multi_reduction <add>, %176, %cst_47 [1] : vector<8x512xf32> to vector<8xf32>
    %178 = vector.shape_cast %177 : vector<8xf32> to vector<8x1xf32>
    %c0_48 = arith.constant 0 : index
    %c0_49 = arith.constant 0 : index
    %c0_50 = arith.constant 0 : index
    %179 = vector.load %arg4[%c0_48, %c0_49, %c0_50] : memref<1x8x1xf32, #tpu.memory_space<vmem>>, vector<1x8x1xf32>
    %180 = vector.shape_cast %179 : vector<1x8x1xf32> to vector<8x1xf32>
    %181 = vector.shape_cast %178 : vector<8x1xf32> to vector<1x8x1xf32>
    tpu.vector_store %arg4[%c0_48, %c0_49, %c0_50], %181 {strides = array<i32>} : memref<1x8x1xf32, #tpu.memory_space<vmem>>, vector<1x8x1xf32>,
    return
  }
  func.func @transform_0(%arg0: i32) -> (i32, i32, i32) {
    %c0_i32 = arith.constant 0 : i32
    %c0_i32_0 = arith.constant 0 : i32
    %c0_i32_1 = arith.constant 0 : i32
    return %arg0, %c0_i32, %c0_i32_0 : i32, i32, i32
  }
  func.func @transform_1(%arg0: i32) -> (i32, i32) {
    %c0_i32 = arith.constant 0 : i32
    %c0_i32_0 = arith.constant 0 : i32
    %c0_i32_1 = arith.constant 0 : i32
    return %c0_i32, %c0_i32_0 : i32, i32
  }
  func.func @transform_2(%arg0: i32) -> (i32, i32, i32) {
    %c0_i32 = arith.constant 0 : i32
    %c0_i32_0 = arith.constant 0 : i32
    %c0_i32_1 = arith.constant 0 : i32
    return %arg0, %c0_i32, %c0_i32_0 : i32, i32, i32
  }
  func.func @transform_3(%arg0: i32) -> (i32, i32, i32) {
    %c0_i32 = arith.constant 0 : i32
    %c0_i32_0 = arith.constant 0 : i32
    %c0_i32_1 = arith.constant 0 : i32
    return %arg0, %c0_i32, %c0_i32_0 : i32, i32, i32
  }
}

</mosaic_0001>

<bundles_post_ra>
// kernel: tpu_custom_call.1
= control target key start
LH: loop header
LB: loop body
LE: loop exit
PB: predicated region body
PF: predicated region fallthrough
CT: control target
= control target key end

     0   :  { %9 = vsyncpa [#allocation3], 0  ;;  %s1238_s0 = inlined_call_operand.hbm [shape: f32[4,8,384], index: 0, kind: input, shape index: {}]   ;;  %s1239_s1 = inlined_call_operand.hbm [shape: f32[8,72], index: 1, kind: input, shape index: {}]   ;;  %s1240_s2 = inlined_call_operand.vmem [shape: f32[2,8,1], index: 2, kind: output, shape index: {0}]   ;;  %s1241_s3 = inlined_call_operand.vmem [shape: f32[2,8,1], index: 3, kind: output, shape index: {1}]  }
   0x1   :  { %11 = vsyncpa [#allocation3 + $0x1], 0 }
   0x2   :  { %12 = vsyncpa [#allocation5], 0  ;;  %s950_s12 = smov 0   ;;  %s952_s13 = smov 0  }
   0x3   :  { %s954_s14 = smov 0   ;;  %s956_s15 = smov 0  }
   0x4 LB: > { %s969_s16 = sadd.s32 4294967295, %s917_s15   ;;  %s972_s17 = sadd.s32 1, %s917_s15   ;;  %s917_s15 = sphi %s956_s15, %s1249_s15   ;;  %s913_s14 = sphi %s954_s14, %s1248_s14   ;;  %s909_s13 = sphi %s952_s13, %s1247_s13   ;;  %s905_s12 = sphi %s950_s12, %s1246_s12  }
   0x5   : > { %s22_s18 = ssub.s32 %s917_s15, %s972_s17  ;;  %s25_s19 = sadd.s32 1, %s913_s14 }
   0x6   : > { %p23_p0 = scmp.eq.s32.totalorder %s22_s18, 0  ;;  %p32_p1 = scmp.ne.s32.totalorder %s913_s14, %s909_s13 }
   0x7   : > { %p33_p2 = scmp.eq.s32.totalorder %s917_s15, 0  ;;  %p38_p3 = scmp.ne.s32.totalorder %s909_s13, %s905_s12 }
   0x8   : > { %s982_s20 = scalar_select %p23_p0, %s913_s14, %s25_s19  }
   0x9   : > { %p984_p4 = por %p33_p2, %p32_p1  ;;  %p39_p5 = scmp.eq.s32.totalorder %s969_s16, 0 }
   0xa   : > { %p668_p6 = scmp.ge.s32.totalorder %s917_s15, 1  ;;  %p122_p7 = scmp.lt.s32.totalorder %s917_s15, 3 }
   0xb   : > { %p993_p8 = por %p39_p5, %p38_p3  ;;  %s134_s26 = sshll.u32 %s1239_s1, 4  ;;  %s135_s26 = int_to_ptr.hbm [resolvable:$true] %s134_s26 }
   0xc   : > { %p997_p9 = pnand %p668_p6, %p122_p7  ;;  %s919_s27 = smov [#allocation4]  }
   0xd   : > { %s136_s28 = sshll.u32 %s919_s27, 4  ;;  %p729_p12 = scmp.lt.s32.totalorder %s917_s15, 2  ;;  %s137_s28 = int_to_ptr.vmem [resolvable:$true] %s136_s28 }
   0xe   : > { %p720_p10 = pneg %p997_p9  ;;  %s147_s29 = sand.u32 1, %s913_s14  }
   0xf   : > { %s712_s30 = smul.u32 48, %s917_s15  ;;  %p1013_p13 = pnand %p729_p12, %p984_p4 }
  0x10   : > { %p721_p11 = pnand %p720_p10, %p39_p5  ;;  %s711_s5 = smul.u32 48, %s147_s29 }
  0x11   : > { %s157_s8 = scalar_lea.hbm %s1238_s0, %s712_s30  ;;  %s148_s12 = scalar_lea.sflag [#allocation3], %s147_s29 }
  0x12   : > { %723 = dma.hbm_to_vmem [thread:$0]  (!%p721_p11), %s135_s26, 128, %s137_s28, [#allocation5]  }
  0x13   : > { %s158_s9 = sshll.u32 %s157_s8, 4  ;;  %s151_s10 = scalar_lea.vmem [#allocation2], %s711_s5  ;;  %s159_s9 = int_to_ptr.hbm [resolvable:$true] %s158_s9 }
  0x14   : > { %s160_s11 = sshll.u32 %s151_s10, 4  ;;  %s849_s18 = sshra.s32 %s159_s9, 4  ;;  %s161_s11 = int_to_ptr.vmem [resolvable:$true] %s160_s11  ;;  %s850_s18 = int_to_ptr.hbm [resolvable:$true] %s849_s18 }
  0x15   : > { %s851_s15 = scalar_lea.hbm %s850_s18, 48  ;;  %p853_p1 = pneg %p1013_p13 }
  0x16   : > { %p852_p0 = scmp.ne.s32.totalorder %s850_s18, %s851_s15  ;;  %s856_s24 = scalar_lea.hbm %s1238_s0, 96 }
  0x17   : > { %p857_p4 = scmp.lt.s32.totalorder %s850_s18, %s1238_s0  ;;  %p858_p6 = scmp.lt.s32.totalorder %s856_s24, %s851_s15 }
  0x18   : > { %p854_p2 = pnand %p853_p1, %p852_p0 }
  0x19   : > { %p859_p7 = por %p858_p6, %p857_p4 }
  0x1a   : > { %p855_p3 = pneg %p854_p2 }
  0x1c   : > { %p860_p10 = pnand %p859_p7, %p855_p3 }
  0x1e   : > { %863 = shalt.err (!%p860_p10)
}
  0x1f   : > { %s920_s27 = smov 384   ;;  %s921_s28 = smov 24  }
  0x20   : > { %727 = dma.hbm_to_vmem [thread:$0]  (!%p1013_p13), %s159_s9, 768, %s161_s11, %s148_s12, %s920_s27, %s920_s27, %s921_s28  }
  0x21   : > { %172 = sbr.rel (%p997_p9) target bundleno = 514 (0x202), region = 28  ;;  %s174_s29 = sand.u32 (!%p997_p9), 1, %s909_s13  }
  0x22   : > { %s713_s30 = smul.u32 (!%p997_p9), 48, %s174_s29  ;;  %s175_s5 = scalar_lea.sflag (!%p997_p9), [#allocation3], %s174_s29 }
  0x24   : > { %s178_s6 = scalar_lea.vmem (!%p997_p9), [#allocation2], %s713_s30 }
  0x26   : > { %896 = dma.done.wait (%p993_p8), %s175_s5, 768  }
  0x27   : > { %898 = vsyncadd (%p993_p8), %s175_s5, 4294966528 }
  0x28   : > { %900 = dma.done.wait (%p39_p5), [#allocation5], 128  }
  0x29   : > { %902 = vsyncadd (%p39_p5), [#allocation5], 4294967168  ;;  %v1041_v0 = vld [vmem:[%s178_s6 + $0x18] sm:$0xff]  ;;  %v1043_v1 = vld [vmem:[%s178_s6 + $0x20] sm:$0xff]  ;;  %s922_s23 = smov 94   ;;  %s923_s22 = smov 95   ;;  %v219_v9 = vlaneseq }
  0x2a   : > { %450 = vrot.lane.b32.xlu0 %v1041_v0, %s922_s23  ;;  %v774_v2 = vpack.i.bf16 %v1043_v1, %v1041_v0  ;;  %v1048_v3 = vld [vmem:[%s178_s6] sm:$0xff]  ;;  %v680_v4 = vld [vmem:[%s178_s6 + $0x28] sm:$0xff]  ;;  %v271_v6 = vld [vmem:[%s178_s6 + $0x10] sm:$0xff]  ;;  %s924_s4 = smov 96   ;;  %s925_s7 = smov 110   ;;  %vm460_vm12 = vcmask 588800  }
  0x2b   : > { %363 = vrot.lane.b32.xlu2 %v1048_v3, %s922_s23  ;;  %v1052_v5 = vld [vmem:[%s178_s6 + $0x8] sm:$0xff]  ;;  %v779_v7 = vpack.i.bf16 %v1048_v3, %v680_v4  ;;  %s926_s8 = smov 111   ;;  %s927_s9 = smov 112   ;;  %v1071_v10 = vand.u32 127, %v219_v9  ;;  %vm549_vm13 = vcmask 7168  }
  0x2c   : > { %775 = vrot.lane.b32.xlu1 %v774_v2, %s923_s22  ;;  %v784_v8 = vpack.i.bf16 %v271_v6, %v1052_v5  ;;  %s928_s10 = smov 126   ;;  %s929_s11 = smov 127  }
  0x2d   : > { %v226_v11 = vand.u32 15, %v1071_v10  ;;  %vm369_vm0 = vcmp.lt.s32.totalorder %v1071_v10, 94  ;;  %v221_v17 = vadd.s32 128, %v1071_v10  ;;  %vm358_vm2 = vcmp.lt.s32.totalorder %v1071_v10, 95  ;;  %p211_p5 = scmp.lt.s32.totalorder %s969_s16, 1 }
  0x2e   : > { %vm347_vm4 = vcmp.lt.s32.totalorder %v1071_v10, 96  ;;  %vm336_vm6 = vcmp.lt.s32.totalorder %v1071_v10, 110  ;;  %vm325_vm7 = vcmp.lt.s32.totalorder %v1071_v10, 111  ;;  %vm314_vm9 = vcmp.lt.s32.totalorder %v1071_v10, 112 }
  0x2f   : > { %v1076_v13 = vadd.s32 1, %v226_v11  ;;  %v233_v19 = vand.u32 15, %v221_v17  ;;  %v1099_v31 = vadd.s32 4294967295, %v226_v11  ;;  %vm299_vm10 = vcmp.lt.s32.totalorder %v1071_v10, 126  ;;  %s1251_s16 = smov (!%p211_p5, %s969_s16), 1 }
  0x30   : > { %vm284_vm11 = vcmp.lt.s32.totalorder %v1071_v10, 127  ;;  %s676_s12 = sshll.u32 %s1251_s16, 3 }
  0x31   : > { %vm264_vm1 = vcmp.lt.s32.totalorder %v1076_v13, 16  ;;  %v1085_v22 = vadd.s32 1, %v233_v19  ;;  %vm248_vm5 = vcmp.ge.s32.totalorder %v1099_v31, 0  ;;  %v1113_v44 = vadd.s32 4294967295, %v233_v19  ;;  %s214_s19 = scalar_lea.vmem %s1240_s2, %s676_s12  ;;  %s218_s25 = scalar_lea.vmem %s1241_s3, %s676_s12 }
  0x32   : > { %452 = vrot.lane.b32.xlu0 %v1043_v1, %s922_s23 }
  0x33   : > { %365 = vrot.lane.b32.xlu2 %v1052_v5, %s922_s23  ;;  %vm265_vm3 = vcmp.lt.s32.totalorder %v1085_v22, 16  ;;  %vm249_vm8 = vcmp.ge.s32.totalorder %v1113_v44, 0 }
  0x34   : > { %454 = vrot.lane.b32.xlu1 %v680_v4, %s922_s23 }
  0x3a   : > { %367 = vrot.lane.b32.xlu0 %v271_v6, %s922_s23 }
  0x3b   : > { %432 = vrot.lane.b32.xlu2 %v1043_v1, %s924_s4 }
  0x3c   : > { %430 = vrot.lane.b32.xlu1 %v1041_v0, %s924_s4 }
  0x42   : > { %780 = vrot.lane.b32.xlu0 %v779_v7, %s923_s22 }
  0x43   : > { %420 = vrot.lane.b32.xlu2 %v1041_v0, %s925_s7 }
  0x44   : > { %785 = vrot.lane.b32.xlu1 %v784_v8, %s923_s22 }
  0x4a   : > { %422 = vrot.lane.b32.xlu0 %v1043_v1, %s925_s7 }
  0x4b   : > { %341 = vrot.lane.b32.xlu2 %v1048_v3, %s924_s4 }
  0x4c   : > { %434 = vrot.lane.b32.xlu1 %v680_v4, %s924_s4 }
  0x52   : > { %343 = vrot.lane.b32.xlu0 %v1052_v5, %s924_s4 }
  0x53   : > { %790 = vrot.lane.b32.xlu2 %v774_v2, %s926_s8 }
  0x54   : > { %345 = vrot.lane.b32.xlu1 %v271_v6, %s924_s4 }
  0x5a   : > { %424 = vrot.lane.b32.xlu0 %v680_v4, %s925_s7 }
  0x5b   : > { %332 = vrot.lane.b32.xlu2 %v1052_v5, %s925_s7 }
  0x5c   : > { %330 = vrot.lane.b32.xlu1 %v1048_v3, %s925_s7 }
  0x62   : > { %334 = vrot.lane.b32.xlu0 %v271_v6, %s925_s7 }
  0x63   : > { %402 = vrot.lane.b32.xlu2 %v1043_v1, %s927_s9 }
  0x64   : > { %400 = vrot.lane.b32.xlu1 %v1041_v0, %s927_s9 }
  0x6a   : > { %795 = vrot.lane.b32.xlu0 %v779_v7, %s926_s8 }
  0x6b   : > { %390 = vrot.lane.b32.xlu2 %v1041_v0, %s928_s10 }
  0x6c   : > { %800 = vrot.lane.b32.xlu1 %v784_v8, %s926_s8 }
  0x72   : > { %392 = vrot.lane.b32.xlu0 %v1043_v1, %s928_s10 }
  0x73   : > { %308 = vrot.lane.b32.xlu2 %v1048_v3, %s927_s9 }
  0x74   : > { %404 = vrot.lane.b32.xlu1 %v680_v4, %s927_s9 }
  0x7a   : > { %310 = vrot.lane.b32.xlu0 %v1052_v5, %s927_s9 }
  0x7b   : > { %805 = vrot.lane.b32.xlu2 %v774_v2, %s929_s11 }
  0x7c   : > { %312 = vrot.lane.b32.xlu1 %v271_v6, %s927_s9 }
  0x82   : > { %394 = vrot.lane.b32.xlu0 %v680_v4, %s928_s10 }
  0x83   : > { %295 = vrot.lane.b32.xlu2 %v1052_v5, %s928_s10 }
  0x84   : > { %293 = vrot.lane.b32.xlu1 %v1048_v3, %s928_s10 }
  0x85   : > { %v364_v12 = vpop.permute.xlu2 %363 }
  0x8a   : > { %297 = vrot.lane.b32.xlu0 %v271_v6, %s928_s10 }
  0x8b   : > { %815 = vrot.lane.b32.xlu2 %v784_v8, %s929_s11 }
  0x8c   : > { %810 = vrot.lane.b32.xlu1 %v779_v7, %s929_s11 }
  0x8d   : > { %v366_v14 = vpop.permute.xlu2 %365 }
  0x8e   : > { %v371_v15 = vsel %vm369_vm0, %v364_v12, %v366_v14 }
  0x8f   : > { %681 = vmatpush.msk.msra.mxu0 %vm264_vm1, %v371_v15 }
  0x95   : > { %v433_v16 = vpop.permute.xlu2 %432 }
  0x9c   : > { %v451_v18 = vpop.permute.xlu0 %450 }
  0x9d   : > { %v421_v20 = vpop.permute.xlu2 %420 }
  0x9e   : > { %v776_v21 = vpop.permute.xlu1 %775 }
  0x9f   : > { %v778_v23 = vunpack.i.h.bf16 %v776_v21  ;;  %v777_v24 = vunpack.i.l.bf16 %v776_v21 }
  0xa1   : > { %v447_v29 = vsel %vm358_vm2, %v777_v24, %v778_v23 }
  0xa4   : > { %v453_v25 = vpop.permute.xlu0 %452 }
  0xa5   : > { %v457_v26 = vsel %vm369_vm0, %v451_v18, %v453_v25  ;;  %v342_v27 = vpop.permute.xlu2 %341 }
  0xa6   : > { %v455_v28 = vpop.permute.xlu1 %454  ;;  %695 = vmatpush.msk.msra.mxu2 %vm264_vm1, %v457_v26 }
  0xa7   : > { %v456_v30 = vsel %vm369_vm0, %v453_v25, %v455_v28 }
  0xa8   : > { %512 = vmatpush.msra.mxu2 %v447_v29  ;;  %702 = vmatpush.msk.msra.mxu3 %vm265_vm3, %v456_v30  ;;  %v268_v30 = vld [vmem:[#allocation4] sm:$0xff] }
  0xac   : > { %v368_v32 = vpop.permute.xlu0 %367 }
  0xad   : > { %v370_v33 = vsel %vm369_vm0, %v366_v14, %v368_v32  ;;  %v791_v35 = vpop.permute.xlu2 %790 }
  0xae   : > { %v431_v34 = vpop.permute.xlu1 %430  ;;  %688 = vmatpush.msk.msra.mxu1 %vm265_vm3, %v370_v33  ;;  %v793_v48 = vunpack.i.h.bf16 %v791_v35  ;;  %v792_v49 = vunpack.i.l.bf16 %v791_v35 }
  0xaf   : > { %v437_v36 = vsel %vm347_vm4, %v431_v34, %v433_v16 }
  0xb0   : > { %696 = vmatpush.msk.msra.mxu2 %vm248_vm5, %v437_v36  ;;  %v417_v52 = vsel %vm325_vm7, %v792_v49, %v793_v48 }
  0xb4   : > { %v781_v37 = vpop.permute.xlu0 %780 }
  0xb5   : > { %v783_v38 = vunpack.i.h.bf16 %v781_v37  ;;  %v782_v39 = vunpack.i.l.bf16 %v781_v37  ;;  %v333_v45 = vpop.permute.xlu2 %332 }
  0xb6   : > { %v786_v40 = vpop.permute.xlu1 %785 }
  0xb7   : > { %v788_v41 = vunpack.i.h.bf16 %v786_v40  ;;  %v787_v42 = vunpack.i.l.bf16 %v786_v40  ;;  %v446_v43 = vsel %vm358_vm2, %v778_v23, %v782_v39 }
  0xb8   : > { %532 = vmatpush.msra.mxu3 %v446_v43 }
  0xb9   : > { %v360_v46 = vsel %vm358_vm2, %v783_v38, %v787_v42  ;;  %v359_v47 = vsel %vm358_vm2, %v787_v42, %v788_v41 }
  0xba   : > { %472 = vmatpush.msra.mxu0 %v360_v46  ;;  %492 = vmatpush.msra.mxu1 %v359_v47 }
  0xbc   : > { %v423_v50 = vpop.permute.xlu0 %422 }
  0xbd   : > { %v427_v51 = vsel %vm336_vm6, %v421_v20, %v423_v50  ;;  %v403_v55 = vpop.permute.xlu2 %402 }
  0xbe   : > { %v435_v53 = vpop.permute.xlu1 %434  ;;  %697 = vmatpush.msk.msra.mxu2 %vm264_vm1, %v427_v51 }
  0xbf   : > { %v436_v54 = vsel %vm347_vm4, %v433_v16, %v435_v53 }
  0xc0   : > { %703 = vmatpush.msk.msra.mxu3 %vm249_vm8, %v436_v54  ;;  %515 = vmatpush.msra.mxu2 %v417_v52 }
  0xc4   : > { %v344_v56 = vpop.permute.xlu0 %343 }
  0xc5   : > { %v349_v57 = vsel %vm347_vm4, %v342_v27, %v344_v56  ;;  %v391_v61 = vpop.permute.xlu2 %390 }
  0xc6   : > { %v346_v58 = vpop.permute.xlu1 %345  ;;  %682 = vmatpush.msk.msra.mxu0 %vm248_vm5, %v349_v57 }
  0xc7   : > { %v348_v59 = vsel %vm347_vm4, %v344_v56, %v346_v58 }
  0xc8   : > { %689 = vmatpush.msk.msra.mxu1 %vm249_vm8, %v348_v59 }
  0xcc   : > { %v425_v60 = vpop.permute.xlu0 %424 }
  0xcd   : > { %v426_v62 = vsel %vm336_vm6, %v423_v50, %v425_v60  ;;  %v309_v8 = vpop.permute.xlu2 %308 }
  0xce   : > { %v331_v63 = vpop.permute.xlu1 %330  ;;  %704 = vmatpush.msk.msra.mxu3 %vm265_vm3, %v426_v62 }
  0xcf   : > { %v338_v2 = vsel %vm336_vm6, %v331_v63, %v333_v45 }
  0xd0   : > { %683 = vmatpush.msk.msra.mxu0 %vm264_vm1, %v338_v2 }
  0xd4   : > { %v335_v4 = vpop.permute.xlu0 %334 }
  0xd5   : > { %v337_v6 = vsel %vm336_vm6, %v333_v45, %v335_v4  ;;  %v806_v19 = vpop.permute.xlu2 %805 }
  0xd6   : > { %v401_v7 = vpop.permute.xlu1 %400  ;;  %690 = vmatpush.msk.msra.mxu1 %vm265_vm3, %v337_v6  ;;  %v808_v23 = vunpack.i.h.bf16 %v806_v19  ;;  %v807_v24 = vunpack.i.l.bf16 %v806_v19 }
  0xd7   : > { %v407_v9 = vsel %vm314_vm9, %v401_v7, %v403_v55 }
  0xd8   : > { %698 = vmatpush.msk.msra.mxu2 %vm248_vm5, %v407_v9  ;;  %v387_v27 = vsel %vm284_vm11, %v807_v24, %v808_v23 }
  0xdc   : > { %v796_v11 = vpop.permute.xlu0 %795 }
  0xdd   : > { %v798_v12 = vunpack.i.h.bf16 %v796_v11  ;;  %v797_v14 = vunpack.i.l.bf16 %v796_v11  ;;  %v296_v35 = vpop.permute.xlu2 %295 }
  0xde   : > { %v801_v15 = vpop.permute.xlu1 %800 }
  0xdf   : > { %v803_v16 = vunpack.i.h.bf16 %v801_v15  ;;  %v802_v17 = vunpack.i.l.bf16 %v801_v15  ;;  %v416_v18 = vsel %vm325_vm7, %v793_v48, %v797_v14 }
  0xe0   : > { %535 = vmatpush.msra.mxu3 %v416_v18 }
  0xe1   : > { %v327_v20 = vsel %vm325_vm7, %v798_v12, %v802_v17  ;;  %v326_v21 = vsel %vm325_vm7, %v802_v17, %v803_v16 }
  0xe2   : > { %475 = vmatpush.msra.mxu0 %v327_v20  ;;  %495 = vmatpush.msra.mxu1 %v326_v21 }
  0xe4   : > { %v393_v25 = vpop.permute.xlu0 %392 }
  0xe5   : > { %v397_v26 = vsel %vm299_vm10, %v391_v61, %v393_v25  ;;  %v816_v40 = vpop.permute.xlu2 %815 }
  0xe6   : > { %v405_v28 = vpop.permute.xlu1 %404  ;;  %699 = vmatpush.msk.msra.mxu2 %vm264_vm1, %v397_v26  ;;  %v818_v41 = vunpack.i.h.bf16 %v816_v40  ;;  %v817_v42 = vunpack.i.l.bf16 %v816_v40 }
  0xe7   : > { %v406_v29 = vsel %vm314_vm9, %v403_v55, %v405_v28 }
  0xe8   : > { %705 = vmatpush.msk.msra.mxu3 %vm249_vm8, %v406_v29  ;;  %518 = vmatpush.msra.mxu2 %v387_v27  ;;  %v285_v46 = vsel %vm284_vm11, %v817_v42, %v818_v41 }
  0xea   : > { %700 = vmatpush.msk.msra.mxu2 %vm248_vm5, %v1041_v0 }
  0xeb   : > { %701 = vmatmul.msk.f32.vlgmr.msra.gmra.mxu2 %vm460_vm12, %v268_v30 }
  0xec   : > { %v311_v32 = vpop.permute.xlu0 %310 }
  0xed   : > { %v316_v33 = vsel %vm314_vm9, %v309_v8, %v311_v32 }
  0xee   : > { %v313_v34 = vpop.permute.xlu1 %312  ;;  %684 = vmatpush.msk.msra.mxu0 %vm248_vm5, %v316_v33 }
  0xef   : > { %v315_v36 = vsel %vm314_vm9, %v311_v32, %v313_v34 }
  0xf0   : > { %691 = vmatpush.msk.msra.mxu1 %vm249_vm8, %v315_v36 }
  0xf4   : > { %v395_v37 = vpop.permute.xlu0 %394 }
  0xf5   : > { %v396_v0 = vsel %vm299_vm10, %v393_v25, %v395_v37 }
  0xf6   : > { %v294_v38 = vpop.permute.xlu1 %293  ;;  %706 = vmatpush.msk.msra.mxu3 %vm265_vm3, %v396_v0 }
  0xf7   : > { %v301_v39 = vsel %vm299_vm10, %v294_v38, %v296_v35 }
  0xf8   : > { %685 = vmatpush.msk.msra.mxu0 %vm264_vm1, %v301_v39 }
  0xfc   : > { %v298_v43 = vpop.permute.xlu0 %297 }
  0xfd   : > { %v300_v45 = vsel %vm299_vm10, %v296_v35, %v298_v43 }
  0xfe   : > { %v811_v47 = vpop.permute.xlu1 %810  ;;  %692 = vmatpush.msk.msra.mxu1 %vm265_vm3, %v300_v45 }
  0xff   : > { %v813_v48 = vunpack.i.h.bf16 %v811_v47  ;;  %v812_v49 = vunpack.i.l.bf16 %v811_v47 }
 0x100   : > { %498 = vmatpush.msra.mxu1 %v285_v46 }
 0x101   : > { %v286_v13 = vsel %vm284_vm11, %v813_v48, %v817_v42  ;;  %v386_v50 = vsel %vm284_vm11, %v808_v23, %v812_v49 }
 0x102   : > { %478 = vmatpush.msra.mxu0 %v286_v13  ;;  %538 = vmatpush.msra.mxu3 %v386_v50 }
 0x103   : > { %693 = vmatpush.msk.msra.mxu1 %vm249_vm8, %v1052_v5 }
 0x104   : > { %707 = vmatpush.msk.msra.mxu3 %vm249_vm8, %v1043_v1  ;;  %686 = vmatpush.msk.msra.mxu0 %vm248_vm5, %v1048_v3 }
 0x105   : > { %708 = vmatmul.msk.f32.vlgmr.msra.gmra.mxu3 %vm460_vm12, %v268_v30  ;;  %687 = vmatmul.msk.f32.vlgmr.msra.gmra.mxu0 %vm460_vm12, %v268_v30 }
 0x106   : > { %694 = vmatmul.msk.f32.vlgmr.msra.gmra.mxu1 %vm460_vm12, %v268_v30 }
 0x16e   : > { %v521_v10 = vpop.f32.mrf.mxu2 }
 0x16f   : > { %v553_v44 = vmul.f32 %v521_v10, %v521_v10 }
 0x182   : > { %v481_v22 = vpop.f32.mrf.mxu0 }
 0x183   : > { %v551_v51 = vmul.f32 %v481_v22, %v481_v22  ;;  %v501_v5 = vpop.f32.mrf.mxu1 }
 0x184   : > { %v544_v52 = vadd.f32 %v501_v5, %v481_v22  ;;  %v552_v53 = vmul.f32 %v501_v5, %v501_v5 }
 0x186   : > { %v555_v1 = vadd.f32 %v552_v53, %v551_v51  ;;  %v545_v54 = vadd.f32 %v544_v52, %v521_v10 }
 0x188   : > { %v556_v55 = vadd.f32 %v555_v1, %v553_v44  ;;  %v541_v31 = vpop.f32.mrf.mxu3 }
 0x189   : > { %v546_v3 = vadd.f32 %v545_v54, %v541_v31  ;;  %v554_v56 = vmul.f32 %v541_v31, %v541_v31 }
 0x18b   : > { %547 = vadd.xlane.f32.xlu0 %v546_v3  ;;  %v557_v57 = vadd.f32 %v556_v55, %v554_v56 }
 0x18d   : > { %558 = vadd.xlane.f32.xlu1 %v557_v57 }
 0x1fe   : > { %v548_v58 = vpop.xlane.xlu0 %547 }
 0x1ff   : > { %550 = vst.msk [vmem:[%s214_s19] sm:$0xff] %vm549_vm13, %v548_v58 }
 0x200   : > { %v559_v59 = vpop.xlane.xlu1 %558 }
 0x201   : > { %560 = vst.msk [vmem:[%s218_s25] sm:$0xff] %vm549_vm13, %v559_v59 }
 0x202 PF: > { %p15_p8 = scmp.ge.s32.totalorder %s972_s17, 4   ;;  %s1246_s12 = smov %s909_s13 }
 0x203   : > { %s1247_s13 = smov %s913_s14  ;;  %s1248_s14 = smov %s982_s20 }
 0x204   : > { %s1249_s15 = smov %s972_s17  ;;  %17 = sbr.rel (!%p15_p8) target bundleno = 4 (0x4), region = 85 }
 0x209   :  { %594 = vsyncpa [#allocation3], 1 }
 0x20a   :  { %596 = vsyncpa [#allocation3 + $0x1], 1 }
 0x20b   :  { %597 = vsyncpa [#allocation5], 1 }

</bundles_post_ra>
